<compile_context>
chip_gen: v5e
topology: v5e:2x2
jax: 0.10.0
libtpu: 0.0.40
codegen_flags: <defaults>
</compile_context>

<pallas_src>
import functools

import jax
import jax.numpy as jnp
from jax.experimental import pallas as pl
from jax.experimental.pallas import tpu as pltpu


def _round_up(v: int, m: int) -> int:
    return ((v + m - 1) // m) * m


def mlp_kernel(x_ref, w1t_ref, w2t_ref, o_ref):
    # x_ref  : [TB, IN_p]      w1t_ref : [IN_p, HID_p]
    # w2t_ref: [HID_p, OUT_p]  o_ref   : [TB, OUT_p]
    x = x_ref[...]

    # hidden = relu(x @ W1^T)  -- W1 already transposed to [IN, HID] in wrapper,
    # so this is an MXU-native [M,K]x[K,N] matmul with f32 accumulation.
    h = jnp.dot(x, w1t_ref[...], preferred_element_type=jnp.float32)
    h = jnp.maximum(h, 0.0)  # ReLU (f32 on the VPU); dropout(p=0.0) is identity.

    # out = hidden @ W2^T  -- cast h back to the matmul input dtype (no-op for f32).
    out = jnp.dot(h.astype(w2t_ref.dtype), w2t_ref[...],
                  preferred_element_type=jnp.float32)
    o_ref[...] = out.astype(o_ref.dtype)


def mlp_forward(x, w1, w2, *, tile_b=256, compute_dtype=None):
    """Fused 2-layer MLP forward on TPU via Pallas.

    x  : [B, input_size]
    w1 : [hidden_size, input_size]   (PyTorch nn.Linear weight layout)
    w2 : [output_size, hidden_size]
    """
    B, in_dim = x.shape
    hid, in_dim_w = w1.shape
    out_dim, hid_w = w2.shape
    assert in_dim == in_dim_w and hid == hid_w

    cdtype = jnp.dtype(compute_dtype) if compute_dtype is not None else x.dtype
    out_dtype = x.dtype
    lane = 128

    # ---- pad feature dims to lane multiples; pre-transpose weights to [K, N] ----
    in_p = _round_up(in_dim, lane)
    hid_p = _round_up(hid, lane)
    out_p = _round_up(out_dim, lane)

    w1t = jnp.pad(w1.T.astype(cdtype), ((0, in_p - in_dim), (0, hid_p - hid)))
    w2t = jnp.pad(w2.T.astype(cdtype), ((0, hid_p - hid), (0, out_p - out_dim)))

    # ---- choose a batch tile: multiple of 8 sublanes, capped by VMEM budget ----
    itemsize = jnp.dtype(cdtype).itemsize
    vmem_budget = 48 << 20  # leave headroom below the 64 MiB v7x per-TC VMEM
    weight_bytes = 2 * (in_p * hid_p + hid_p * out_p) * itemsize  # double-buffered

    def footprint(tb):
        io_bytes = 2 * tb * (in_p + out_p) * itemsize   # double-buffered x / out
        h_bytes = tb * hid_p * 4                        # f32 hidden intermediate
        return weight_bytes + io_bytes + h_bytes

    tb = min(max(8, tile_b - tile_b % 8), _round_up(B, 8))
    while tb > 8 and footprint(tb) > vmem_budget:
        tb -= 8

    b_pad = _round_up(B, tb)
    x_p = jnp.pad(x.astype(cdtype), ((0, b_pad - B), (0, in_p - in_dim)))

    grid = (b_pad // tb,)
    vmem_limit = min(64 << 20, max(32 << 20, int(footprint(tb) * 1.5)))

    out = pl.pallas_call(
        mlp_kernel,
        out_shape=jax.ShapeDtypeStruct((b_pad, out_p), out_dtype),
        grid_spec=pltpu.PrefetchScalarGridSpec(
            num_scalar_prefetch=0,
            grid=grid,
            in_specs=[
                pl.BlockSpec((tb, in_p), lambda i: (i, 0)),      # x tile (pipelined)
                pl.BlockSpec((in_p, hid_p), lambda i: (0, 0)),   # W1^T (grid-invariant)
                pl.BlockSpec((hid_p, out_p), lambda i: (0, 0)),  # W2^T (grid-invariant)
            ],
            out_specs=pl.BlockSpec((tb, out_p), lambda i: (i, 0)),
        ),
        compiler_params=pltpu.CompilerParams(
            dimension_semantics=("parallel",),
            vmem_limit_bytes=vmem_limit,
        ),
    )(x_p, w1t, w2t)

    # Strip batch / output-lane padding.
    return out[:B, :out_dim]


def mlp_reference(x, w1, w2):
    h = jnp.maximum(x @ w1.T, 0.0)
    return h @ w2.T


# TODO(synk): generalize the fused kernel to num_hidden > 2 (extra hidden->hidden
# Linears + ReLU) by chaining layer pairs; the module default num_hidden=2 is
# what is implemented here.

if __name__ == "__main__":
    # Small shapes consistent with MLP(input_size=32, hidden_size=64,
    # output_size=16, num_hidden=2), batch = 8.
    B, IN, HID, OUT = 8, 32, 64, 16

    key = jax.random.PRNGKey(0)
    kx, k1, k2 = jax.random.split(key, 3)

    x = jax.random.normal(kx, (B, IN), dtype=jnp.float32)
    # Deterministic parameter init (mimics nn.Linear kaiming-uniform scale).
    bound1 = 1.0 / (IN ** 0.5)
    bound2 = 1.0 / (HID ** 0.5)
    w1 = jax.random.uniform(k1, (HID, IN), jnp.float32, -bound1, bound1)
    w2 = jax.random.uniform(k2, (OUT, HID), jnp.float32, -bound2, bound2)

    fwd = jax.jit(functools.partial(mlp_forward, tile_b=256))
    out = jax.block_until_ready(fwd(x, w1, w2))

    ref = mlp_reference(x, w1, w2)
    assert out.shape == (B, OUT)
    assert jnp.allclose(out, ref, atol=1e-5, rtol=1e-5), "mismatch vs reference"

    print("KERNEL_OK")
</pallas_src>

<mosaic_0001>
module attributes {stable_mosaic.version = 11 : i64} {
  func.func @mlp_kernel(%arg0: i32, %arg1: memref<8x128xf32, #tpu.memory_space<vmem>>, %arg2: memref<128x128xf32, #tpu.memory_space<vmem>>, %arg3: memref<128x128xf32, #tpu.memory_space<vmem>>, %arg4: memref<8x128xf32, #tpu.memory_space<vmem>>) attributes {dimension_semantics = [#tpu.dimension_semantics<parallel>], iteration_bounds = array<i64: 1>, scalar_prefetch = 0 : i64, scratch_operands = 0 : i64, tpu.core_type = #tpu.core_type<tc>, window_params = [{transform_indices = @transform_0, window_bounds = array<i64: 8, 128>}, {pipeline_mode = #tpu.pipeline_mode<synchronous>, transform_indices = @transform_1, window_bounds = array<i64: 128, 128>}, {pipeline_mode = #tpu.pipeline_mode<synchronous>, transform_indices = @transform_2, window_bounds = array<i64: 128, 128>}, {transform_indices = @transform_3, window_bounds = array<i64: 8, 128>}]} {
    %c0 = arith.constant 0 : index
    %c0_0 = arith.constant 0 : index
    %0 = vector.load %arg1[%c0, %c0_0] : memref<8x128xf32, #tpu.memory_space<vmem>>, vector<8x128xf32>
    %c0_1 = arith.constant 0 : index
    %c0_2 = arith.constant 0 : index
    %1 = vector.load %arg2[%c0_1, %c0_2] : memref<128x128xf32, #tpu.memory_space<vmem>>, vector<128x128xf32>
    %cst = arith.constant dense<0.000000e+00> : vector<8x128xf32>
    %2 = tpu.matmul %0, %1, %cst {dimension_numbers = #tpu.dot_dimension_numbers<[1], [0], [0], [1], [0, 0, 1, 1], [], []>} : vector<8x128xf32>, vector<128x128xf32>, vector<8x128xf32> -> vector<8x128xf32>
    %cst_3 = arith.constant 0.000000e+00 : f32
    %3 = vector.broadcast %cst_3 : f32 to vector<8x128xf32>
    %4 = arith.maximumf %2, %3 : vector<8x128xf32>
    %c0_4 = arith.constant 0 : index
    %c0_5 = arith.constant 0 : index
    %5 = vector.load %arg3[%c0_4, %c0_5] : memref<128x128xf32, #tpu.memory_space<vmem>>, vector<128x128xf32>
    %cst_6 = arith.constant dense<0.000000e+00> : vector<8x128xf32>
    %6 = tpu.matmul %4, %5, %cst_6 {dimension_numbers = #tpu.dot_dimension_numbers<[1], [0], [0], [1], [0, 0, 1, 1], [], []>} : vector<8x128xf32>, vector<128x128xf32>, vector<8x128xf32> -> vector<8x128xf32>
    %c0_7 = arith.constant 0 : index
    %c0_8 = arith.constant 0 : index
    %7 = vector.load %arg4[%c0_7, %c0_8] : memref<8x128xf32, #tpu.memory_space<vmem>>, vector<8x128xf32>
    tpu.vector_store %arg4[%c0_7, %c0_8], %6 {strides = array<i32>} : memref<8x128xf32, #tpu.memory_space<vmem>>, vector<8x128xf32>,
    return
  }
  func.func @transform_0(%arg0: i32) -> (i32, i32) {
    %c0_i32 = arith.constant 0 : i32
    %c0_i32_0 = arith.constant 0 : i32
    return %arg0, %c0_i32 : i32, i32
  }
  func.func @transform_1(%arg0: i32) -> (i32, i32) {
    %c0_i32 = arith.constant 0 : i32
    %c0_i32_0 = arith.constant 0 : i32
    %c0_i32_1 = arith.constant 0 : i32
    return %c0_i32, %c0_i32_0 : i32, i32
  }
  func.func @transform_2(%arg0: i32) -> (i32, i32) {
    %c0_i32 = arith.constant 0 : i32
    %c0_i32_0 = arith.constant 0 : i32
    %c0_i32_1 = arith.constant 0 : i32
    return %c0_i32, %c0_i32_0 : i32, i32
  }
  func.func @transform_3(%arg0: i32) -> (i32, i32) {
    %c0_i32 = arith.constant 0 : i32
    %c0_i32_0 = arith.constant 0 : i32
    return %arg0, %c0_i32 : i32, i32
  }
}

</mosaic_0001>

<bundles_post_ra>
// kernel: mlp_forward.1
= control target key start
LH: loop header
LB: loop body
LE: loop exit
PB: predicated region body
PF: predicated region fallthrough
CT: control target
= control target key end

     0   :  { %s256_s0 = inlined_call_operand.vmem [shape: f32[8,128], index: 0, kind: input, shape index: {}]   ;;  %s257_s1 = inlined_call_operand.vmem [shape: f32[128,128], index: 1, kind: input, shape index: {}]   ;;  %s258_s2 = inlined_call_operand.vmem [shape: f32[128,128], index: 2, kind: input, shape index: {}]   ;;  %s259_s3 = inlined_call_operand.hbm [shape: f32[8,128], index: 3, kind: output, shape index: {}]  }
   0x1   :  { %v31_v0 = vld [vmem:[%s257_s1 + $0x78] sm:$0xff]  ;;  %v30_v1 = vld [vmem:[%s257_s1 + $0x70] sm:$0xff]  ;;  %v29_v2 = vld [vmem:[%s257_s1 + $0x68] sm:$0xff] }
   0x2   :  { %32 = vmatpush.msra.mxu0 %v31_v0  ;;  %v28_v3 = vld [vmem:[%s257_s1 + $0x60] sm:$0xff]  ;;  %v68_v4 = vld [vmem:[%s258_s2 + $0x78] sm:$0xff]  ;;  %v67_v6 = vld [vmem:[%s258_s2 + $0x70] sm:$0xff] }
   0x3   :  { %v27_v5 = vld [vmem:[%s257_s1 + $0x58] sm:$0xff]  ;;  %69 = vmatpush.msra.mxu1 %v68_v4  ;;  %v66_v7 = vld [vmem:[%s258_s2 + $0x68] sm:$0xff]  ;;  %v26_v8 = vld [vmem:[%s257_s1 + $0x50] sm:$0xff] }
   0x4   :  { %33 = vmatpush.msra.mxu0 %v30_v1  ;;  %v65_v9 = vld [vmem:[%s258_s2 + $0x60] sm:$0xff]  ;;  %v25_v10 = vld [vmem:[%s257_s1 + $0x48] sm:$0xff] }
   0x5   :  { %70 = vmatpush.msra.mxu1 %v67_v6 }
   0x6   :  { %34 = vmatpush.msra.mxu0 %v29_v2 }
   0x7   :  { %71 = vmatpush.msra.mxu1 %v66_v7 }
   0x8   :  { %35 = vmatpush.msra.mxu0 %v28_v3 }
   0xa   :  { %36 = vmatpush.msra.mxu0 %v27_v5 }
   0xb   :  { %8 = vsyncpa [#allocation3], 0  ;;  %v64_v11 = vld [vmem:[%s258_s2 + $0x58] sm:$0xff]  ;;  %v24_v12 = vld [vmem:[%s257_s1 + $0x40] sm:$0xff]  ;;  %72 = vmatpush.msra.mxu1 %v65_v9  ;;  %s97_s26 = sshll.u32 %s259_s3, 4  ;;  %s98_s26 = int_to_ptr.hbm [resolvable:$true] %s97_s26 }
   0xc   :  { %37 = vmatpush.msra.mxu0 %v26_v8  ;;  %v63_v13 = vld [vmem:[%s258_s2 + $0x50] sm:$0xff]  ;;  %v23_v14 = vld [vmem:[%s257_s1 + $0x38] sm:$0xff]  ;;  %v62_v15 = vld [vmem:[%s258_s2 + $0x48] sm:$0xff] }
   0xd   :  { %73 = vmatpush.msra.mxu1 %v64_v11  ;;  %v22_v16 = vld [vmem:[%s257_s1 + $0x30] sm:$0xff]  ;;  %v61_v17 = vld [vmem:[%s258_s2 + $0x40] sm:$0xff]  ;;  %v21_v18 = vld [vmem:[%s257_s1 + $0x28] sm:$0xff] }
   0xe   :  { %38 = vmatpush.msra.mxu0 %v25_v10  ;;  %v60_v19 = vld [vmem:[%s258_s2 + $0x38] sm:$0xff]  ;;  %v20_v20 = vld [vmem:[%s257_s1 + $0x20] sm:$0xff]  ;;  %v59_v21 = vld [vmem:[%s258_s2 + $0x30] sm:$0xff] }
   0xf   :  { %74 = vmatpush.msra.mxu1 %v63_v13  ;;  %v19_v22 = vld [vmem:[%s257_s1 + $0x18] sm:$0xff]  ;;  %v58_v23 = vld [vmem:[%s258_s2 + $0x28] sm:$0xff]  ;;  %v18_v24 = vld [vmem:[%s257_s1 + $0x10] sm:$0xff] }
  0x10   :  { %39 = vmatpush.msra.mxu0 %v24_v12  ;;  %v57_v25 = vld [vmem:[%s258_s2 + $0x20] sm:$0xff]  ;;  %v17_v26 = vld [vmem:[%s257_s1 + $0x8] sm:$0xff]  ;;  %v56_v27 = vld [vmem:[%s258_s2 + $0x18] sm:$0xff] }
  0x11   :  { %75 = vmatpush.msra.mxu1 %v62_v15  ;;  %v16_v28 = vld [vmem:[%s257_s1] sm:$0xff]  ;;  %v55_v30 = vld [vmem:[%s258_s2 + $0x10] sm:$0xff]  ;;  %v54_v31 = vld [vmem:[%s258_s2 + $0x8] sm:$0xff] }
  0x12   :  { %40 = vmatpush.msra.mxu0 %v23_v14  ;;  %v15_v29 = vld [vmem:[%s256_s0] sm:$0xff]  ;;  %s133_s0 = smov [#allocation2]  }
  0x13   :  { %76 = vmatpush.msra.mxu1 %v61_v17  ;;  %v53_v32 = vld [vmem:[%s258_s2] sm:$0xff]  ;;  %s95_s23 = sshll.u32 %s133_s0, 4  ;;  %s96_s23 = int_to_ptr.vmem [resolvable:$true] %s95_s23 }
  0x14   :  { %41 = vmatpush.msra.mxu0 %v22_v16 }
  0x15   :  { %77 = vmatpush.msra.mxu1 %v60_v19 }
  0x16   :  { %42 = vmatpush.msra.mxu0 %v21_v18 }
  0x17   :  { %78 = vmatpush.msra.mxu1 %v59_v21 }
  0x18   :  { %43 = vmatpush.msra.mxu0 %v20_v20 }
  0x19   :  { %79 = vmatpush.msra.mxu1 %v58_v23 }
  0x1a   :  { %44 = vmatpush.msra.mxu0 %v19_v22 }
  0x1b   :  { %80 = vmatpush.msra.mxu1 %v57_v25 }
  0x1c   :  { %45 = vmatpush.msra.mxu0 %v18_v24 }
  0x1d   :  { %81 = vmatpush.msra.mxu1 %v56_v27 }
  0x1e   :  { %46 = vmatpush.msra.mxu0 %v17_v26 }
  0x1f   :  { %82 = vmatpush.msra.mxu1 %v55_v30 }
  0x20   :  { %47 = vmatpush.msra.mxu0 %v16_v28 }
  0x21   :  { %48 = vmatmul.f32.vlgmr.msra.gmra.mxu0 %v15_v29  ;;  %83 = vmatpush.msra.mxu1 %v54_v31 }
  0x23   :  { %84 = vmatpush.msra.mxu1 %v53_v32 }
  0x9e   :  { %v49_v33 = vpop.f32.mrf.mxu0 }
  0x9f   :  { %v52_v34 = vmax.f32 %v49_v33, 0.0 }
  0xa1   :  { %85 = vmatmul.f32.vlgmr.msra.gmra.mxu1 %v52_v34 }
 0x11e   :  { %v86_v35 = vpop.f32.mrf.mxu1 }
 0x11f   :  { %89 = vst [vmem:[#allocation2] sm:$0xff] %v86_v35 }
 0x120   :  { %100 = dma.vmem_to_hbm [thread:$0]  %s96_s23, 128, %s98_s26, [#allocation3]  }
 0x121   :  { %131 = dma.done.wait [#allocation3], 128  }
 0x122   :  { %132 = vsyncadd [#allocation3], 4294967168 }
 0x123   :  { %105 = vsyncpa [#allocation3], 1 }

</bundles_post_ra>
